<compile_context>
chip_gen: v7x
topology: tpu7x:2x2x1
jax: 0.10.0
libtpu: 0.0.40
codegen_flags: <defaults>
</compile_context>

<pallas_src>
import functools
import math

import jax
import jax.numpy as jnp
from jax.experimental import pallas as pl
from jax.experimental.pallas import tpu as pltpu

LANES = 128
DEFAULT_BLOCK_ROWS = 4096  # (4096, 128) f32 = 2 MiB per input block


# ---------------------------------------------------------------------------
# Pallas kernel: per-block (1, 128) partial sums of the JSD integrand
# ---------------------------------------------------------------------------
def _jsd_kernel(x1_ref, x2_ref, out_ref, *, logit, rows_total, block_rows,
                needs_mask):
    x1 = x1_ref[...].astype(jnp.float32)
    x2 = x2_ref[...].astype(jnp.float32)
    if logit:
        s1 = jax.nn.sigmoid(x1)
        s2 = jax.nn.sigmoid(x2)
    else:
        s1, s2 = x1, x2

    eps = jnp.float32(1e-8)
    # Collapsed symmetric-KL integrand (0.5 and 1/(2N) folded into wrapper):
    #   (s2 - s1) * [ (log(s2+e)-log(s1+e)) - (log(1-s2+e)-log(1-s1+e)) ]
    # expressed with one log + one divide instead of four logs.
    num = (s2 + eps) * ((1.0 - s1) + eps)
    den = (s1 + eps) * ((1.0 - s2) + eps)
    term = (s2 - s1) * jnp.log(num / den)

    if needs_mask:
        # Only the last block can read past the (rows_total, 128) slab; garbage
        # rows there (possibly NaN after log) are zeroed before reduction.
        i = pl.program_id(0)
        last = pl.num_programs(0) - 1

        @pl.when(i != last)
        def _():
            out_ref[...] = jnp.sum(term, axis=0, keepdims=True)

        @pl.when(i == last)
        def _():
            row_g = i * block_rows + jax.lax.broadcasted_iota(
                jnp.int32, term.shape, 0)
            masked = jnp.where(row_g < rows_total, term, 0.0)
            out_ref[...] = jnp.sum(masked, axis=0, keepdims=True)
    else:
        out_ref[...] = jnp.sum(term, axis=0, keepdims=True)


# ---------------------------------------------------------------------------
# Module-equivalent wrapper
# ---------------------------------------------------------------------------
def js_div_loss(input1, input2, *, logit=True, block_rows=DEFAULT_BLOCK_ROWS):
    """JAX/Pallas equivalent of JSDivLoss.forward(input1=..., input2=...)."""
    input1 = jnp.asarray(input1)
    input2 = jnp.asarray(input2)
    assert input1.shape == input2.shape, (input1.shape, input2.shape)
    n = math.prod(input1.shape)

    x1 = input1.reshape(-1)
    x2 = input2.reshape(-1)
    rem = (-n) % LANES
    if rem:
        # Rare ragged case: tiny tail pad to a lane multiple.  Padded zeros
        # contribute exactly 0 to this loss, so no masking is required for them.
        x1 = jnp.pad(x1, (0, rem))
        x2 = jnp.pad(x2, (0, rem))
    rows = (n + rem) // LANES
    x1 = x1.reshape(rows, LANES)
    x2 = x2.reshape(rows, LANES)

    if rows <= block_rows:
        br = rows                            # full-array block: always legal
    else:
        br = max(8, (block_rows // 8) * 8)   # keep (8,128) divisibility
    nblocks = pl.cdiv(rows, br)
    needs_mask = (rows % br) != 0            # static: only then compile masking

    partials = pl.pallas_call(
        functools.partial(_jsd_kernel, logit=logit, rows_total=rows,
                          block_rows=br, needs_mask=needs_mask),
        out_shape=jax.ShapeDtypeStruct((nblocks, LANES), jnp.float32),
        grid=(nblocks,),
        in_specs=[
            pl.BlockSpec((br, LANES), lambda i: (i, 0)),
            pl.BlockSpec((br, LANES), lambda i: (i, 0)),
        ],
        out_specs=pl.BlockSpec((1, LANES), lambda i: (i, 0)),
        compiler_params=pltpu.CompilerParams(
            dimension_semantics=("parallel",),  # no cross-step state
        ),
    )(x1, x2)

    # 0.5 (JSD) * 1/(2N) (KLDivLoss 'mean' over the stacked tensor) = 1/(4N).
    return jnp.sum(partials) / jnp.float32(4 * n)


# ---------------------------------------------------------------------------
# Pure-JAX reference (exact PyTorch formula, for in-script sanity check)
# ---------------------------------------------------------------------------
def _reference_jsd(input1, input2, logit=True):
    x1 = jnp.asarray(input1, jnp.float32)
    x2 = jnp.asarray(input2, jnp.float32)
    s1 = jax.nn.sigmoid(x1) if logit else x1
    s2 = jax.nn.sigmoid(x2) if logit else x2
    p1 = jnp.stack([s1, 1.0 - s1], axis=1)
    p2 = jnp.stack([s2, 1.0 - s2], axis=1)

    def kld_mean(log_input, target):
        ent = jnp.where(target > 0,
                        target * jnp.log(jnp.where(target > 0, target, 1.0)),
                        0.0)
        return jnp.mean(ent - target * log_input)

    return 0.5 * (kld_mean(jnp.log(p1 + 1e-8), p2) +
                  kld_mean(jnp.log(p2 + 1e-8), p1))


if __name__ == "__main__":
    key = jax.random.PRNGKey(0)
    k1, k2, k3, k4, k5, k6 = jax.random.split(key, 6)

    # Primary check: NCHW logits, like the PyTorch module's inputs.
    shape = (2, 4, 16, 16)
    x1 = jax.random.normal(k1, shape, jnp.float32)
    x2 = jax.random.normal(k2, shape, jnp.float32)

    jsd = js_div_loss(x1, x2, logit=True)
    jax.block_until_ready(jsd)
    ref = _reference_jsd(x1, x2, logit=True)
    assert jnp.allclose(jsd, ref, atol=1e-5, rtol=1e-4), (jsd, ref)

    # Multi-block path (parallel grid axis, per-block partial sums).
    jsd2 = js_div_loss(x1, x2, logit=True, block_rows=8)
    jax.block_until_ready(jsd2)
    assert jnp.allclose(jsd2, ref, atol=1e-5, rtol=1e-4), (jsd2, ref)

    # Ragged size (not a multiple of 128): exercises tail pad (no mask needed).
    shape_r = (2, 3, 17, 19)
    y1 = jax.random.normal(k3, shape_r, jnp.float32)
    y2 = jax.random.normal(k4, shape_r, jnp.float32)
    jsd3 = js_div_loss(y1, y2, logit=True, block_rows=8)
    jax.block_until_ready(jsd3)
    ref3 = _reference_jsd(y1, y2, logit=True)
    assert jnp.allclose(jsd3, ref3, atol=1e-5, rtol=1e-4), (jsd3, ref3)

    # rows not a multiple of block_rows: exercises the compiled tail mask.
    shape_m = (1, 17, 128)   # 17 lane-rows, block_rows=8 -> partial last block
    z1 = jax.random.normal(k5, shape_m, jnp.float32)
    z2 = jax.random.normal(k6, shape_m, jnp.float32)
    jsd4 = js_div_loss(z1, z2, logit=True, block_rows=8)
    jax.block_until_ready(jsd4)
    ref4 = _reference_jsd(z1, z2, logit=True)
    assert jnp.allclose(jsd4, ref4, atol=1e-5, rtol=1e-4), (jsd4, ref4)

    # logit=False path (inputs already probabilities).
    p1 = jax.nn.sigmoid(x1)
    p2 = jax.nn.sigmoid(x2)
    jsd5 = js_div_loss(p1, p2, logit=False)
    jax.block_until_ready(jsd5)
    ref5 = _reference_jsd(p1, p2, logit=False)
    assert jnp.allclose(jsd5, ref5, atol=1e-5, rtol=1e-4), (jsd5, ref5)

    print("KERNEL_OK")
</pallas_src>

<mosaic_0001>
module attributes {stable_mosaic.version = 11 : i64} {
  func.func @_jsd_kernel(%arg0: i32, %arg1: memref<16x128xf32, #tpu.memory_space<vmem>>, %arg2: memref<16x128xf32, #tpu.memory_space<vmem>>, %arg3: memref<1x128xf32, #tpu.memory_space<vmem>>) attributes {dimension_semantics = [#tpu.dimension_semantics<parallel>], iteration_bounds = array<i64: 1>, scalar_prefetch = 0 : i64, scratch_operands = 0 : i64, tpu.core_type = #tpu.core_type<tc>, window_params = [{transform_indices = @transform_0, window_bounds = array<i64: 16, 128>}, {transform_indices = @transform_1, window_bounds = array<i64: 16, 128>}, {transform_indices = @transform_2, window_bounds = array<i64: 1, 128>}]} {
    %c0 = arith.constant 0 : index
    %c0_0 = arith.constant 0 : index
    %0 = vector.load %arg1[%c0, %c0_0] : memref<16x128xf32, #tpu.memory_space<vmem>>, vector<16x128xf32>
    %c0_1 = arith.constant 0 : index
    %c0_2 = arith.constant 0 : index
    %1 = vector.load %arg2[%c0_1, %c0_2] : memref<16x128xf32, #tpu.memory_space<vmem>>, vector<16x128xf32>
    %2 = arith.negf %0 : vector<16x128xf32>
    %3 = math.exp %2 : vector<16x128xf32>
    %cst = arith.constant 1.000000e+00 : f32
    %4 = vector.broadcast %cst : f32 to vector<16x128xf32>
    %5 = arith.addf %4, %3 : vector<16x128xf32>
    %6 = arith.divf %4, %5 : vector<16x128xf32>
    %7 = arith.negf %1 : vector<16x128xf32>
    %8 = math.exp %7 : vector<16x128xf32>
    %cst_3 = arith.constant 1.000000e+00 : f32
    %9 = vector.broadcast %cst_3 : f32 to vector<16x128xf32>
    %10 = arith.addf %9, %8 : vector<16x128xf32>
    %11 = arith.divf %9, %10 : vector<16x128xf32>
    %cst_4 = arith.constant 9.99999993E-9 : f32
    %12 = vector.broadcast %cst_4 : f32 to vector<16x128xf32>
    %13 = arith.addf %11, %12 : vector<16x128xf32>
    %cst_5 = arith.constant 1.000000e+00 : f32
    %14 = vector.broadcast %cst_5 : f32 to vector<16x128xf32>
    %15 = arith.subf %14, %6 : vector<16x128xf32>
    %cst_6 = arith.constant 9.99999993E-9 : f32
    %16 = vector.broadcast %cst_6 : f32 to vector<16x128xf32>
    %17 = arith.addf %15, %16 : vector<16x128xf32>
    %18 = arith.mulf %13, %17 : vector<16x128xf32>
    %cst_7 = arith.constant 9.99999993E-9 : f32
    %19 = vector.broadcast %cst_7 : f32 to vector<16x128xf32>
    %20 = arith.addf %6, %19 : vector<16x128xf32>
    %cst_8 = arith.constant 1.000000e+00 : f32
    %21 = vector.broadcast %cst_8 : f32 to vector<16x128xf32>
    %22 = arith.subf %21, %11 : vector<16x128xf32>
    %cst_9 = arith.constant 9.99999993E-9 : f32
    %23 = vector.broadcast %cst_9 : f32 to vector<16x128xf32>
    %24 = arith.addf %22, %23 : vector<16x128xf32>
    %25 = arith.mulf %20, %24 : vector<16x128xf32>
    %26 = arith.subf %11, %6 : vector<16x128xf32>
    %27 = arith.divf %18, %25 : vector<16x128xf32>
    %28 = math.log %27 : vector<16x128xf32>
    %29 = arith.mulf %26, %28 : vector<16x128xf32>
    %cst_10 = arith.constant dense<0.000000e+00> : vector<128xf32>
    %30 = vector.multi_reduction <add>, %29, %cst_10 [0] : vector<16x128xf32> to vector<128xf32>
    %31 = vector.shape_cast %30 : vector<128xf32> to vector<1x128xf32>
    %c0_11 = arith.constant 0 : index
    %c0_12 = arith.constant 0 : index
    %32 = vector.load %arg3[%c0_11, %c0_12] : memref<1x128xf32, #tpu.memory_space<vmem>>, vector<1x128xf32>
    tpu.vector_store %arg3[%c0_11, %c0_12], %31 {strides = array<i32>} : memref<1x128xf32, #tpu.memory_space<vmem>>, vector<1x128xf32>,
    return
  }
  func.func @transform_0(%arg0: i32) -> (i32, i32) {
    %c0_i32 = arith.constant 0 : i32
    %c0_i32_0 = arith.constant 0 : i32
    return %arg0, %c0_i32 : i32, i32
  }
  func.func @transform_1(%arg0: i32) -> (i32, i32) {
    %c0_i32 = arith.constant 0 : i32
    %c0_i32_0 = arith.constant 0 : i32
    return %arg0, %c0_i32 : i32, i32
  }
  func.func @transform_2(%arg0: i32) -> (i32, i32) {
    %c0_i32 = arith.constant 0 : i32
    %c0_i32_0 = arith.constant 0 : i32
    return %arg0, %c0_i32 : i32, i32
  }
}

</mosaic_0001>

<bundles_post_ra>
// kernel: tpu_custom_call.1
= control target key start
LH: loop header
LB: loop body
LE: loop exit
PB: predicated region body
PF: predicated region fallthrough
CT: control target
= control target key end

     0   :  { %7 = vsyncpa [#allocation3], 0  ;;  %s281_s0 = inlined_call_operand.hbm [shape: f32[16,128], index: 0, kind: input, shape index: {}]   ;;  %s282_s1 = inlined_call_operand.hbm [shape: f32[16,128], index: 1, kind: input, shape index: {}]   ;;  %s283_s2 = inlined_call_operand.hbm [shape: f32[1,128], index: 2, kind: output, shape index: {}]  }
   0x1   :  { %8 = vsyncpa [#allocation6], 0 }
   0x2   :  { %9 = vsyncpa [#allocation4], 0  ;;  %s225_s9 = smov [#allocation2]   ;;  %s153_s13 = scalar_lea.hbm %s281_s0, 256 }
   0x3   :  { %s15_s10 = sshll.u32 %s225_s9, 4  ;;  %p154_p0 = scmp.ne.s32.totalorder %s281_s0, %s153_s13  ;;  %s16_s10 = int_to_ptr.vmem [resolvable:$true] %s15_s10 }
   0x4   :  { %p157_p1 = scmp.lt.u32.totalorder %s153_s13, %s281_s0 }
   0x6   :  { %p159_p2 = pnand %p157_p1, %p154_p0 }
   0x8   :  { %162 = shalt.err (!%p159_p2)
}
   0x9   :  { %s163_s18 = scalar_lea.vmem %s16_s10, 256  ;;  %p168_p4 = scmp.lt.s32.totalorder %s16_s10, %s16_s10 }
   0xa   :  { %p164_p3 = scmp.ne.s32.totalorder %s16_s10, %s163_s18  ;;  %p169_p5 = scmp.lt.s32.totalorder %s163_s18, %s163_s18 }
   0xc   :  { %p170_p6 = por %p169_p5, %p168_p4 }
   0xe   :  { %p171_p7 = pnand %p170_p6, %p164_p3 }
  0x10   :  { %174 = shalt.err (!%p171_p7)
}
  0x11   :  { %s226_s19 = smov 128   ;;  %s227_s20 = smov 8  }
  0x12   :  { %21 = dma.hbm_to_vmem [thread:$0]  %s281_s0, 256, %s16_s10, [#allocation3], %s226_s19, %s226_s19, %s227_s20  }
  0x13   :  { %s228_s23 = smov [#allocation5]   ;;  %s175_s27 = scalar_lea.hbm %s282_s1, 256 }
  0x14   :  { %s27_s24 = sshll.u32 %s228_s23, 4  ;;  %p176_p8 = scmp.ne.s32.totalorder %s282_s1, %s175_s27  ;;  %s28_s24 = int_to_ptr.vmem [resolvable:$true] %s27_s24 }
  0x15   :  { %p179_p9 = scmp.lt.u32.totalorder %s175_s27, %s282_s1 }
  0x17   :  { %p181_p10 = pnand %p179_p9, %p176_p8 }
  0x19   :  { %184 = shalt.err (!%p181_p10)
}
  0x1a   :  { %s185_s4 = scalar_lea.vmem %s28_s24, 256  ;;  %p190_p12 = scmp.lt.s32.totalorder %s28_s24, %s28_s24 }
  0x1b   :  { %p186_p11 = scmp.ne.s32.totalorder %s28_s24, %s185_s4  ;;  %p191_p13 = scmp.lt.s32.totalorder %s185_s4, %s185_s4 }
  0x1d   :  { %p192_p0 = por %p191_p13, %p190_p12 }
  0x1f   :  { %p193_p1 = pnand %p192_p0, %p186_p11 }
  0x21   :  { %196 = shalt.err (!%p193_p1)
}
  0x22   :  { %33 = dma.hbm_to_vmem [thread:$0]  %s282_s1, 256, %s28_s24, [#allocation6], %s226_s19, %s226_s19, %s227_s20  }
  0x23   :  { %219 = dma.done.wait [#allocation3], 256  }
  0x24   :  { %220 = vsyncadd [#allocation3], 4294967040 }
  0x25   :  { %221 = dma.done.wait [#allocation6], 256  }
  0x26   :  { %222 = vsyncadd [#allocation6], 4294967040  ;;  %v40_v0 = vld [vmem:[#allocation2] sm:$0xff]  ;;  %v41_v1 = vld [vmem:[#allocation2 + $0x8] sm:$0xff]  ;;  %s229_s1 = smov [#allocation7]  }
  0x27   :  { %v42_v2 = vld [vmem:[#allocation5] sm:$0xff]  ;;  %v43_v3 = vld [vmem:[#allocation5 + $0x8] sm:$0xff]  ;;  %v120_v4 = vmul.f32 -1.442695, %v40_v0  ;;  %v121_v5 = vmul.f32 -1.442695, %v41_v1 }
  0x28   :  { %v122_v6 = vmul.f32 -1.442695, %v42_v2  ;;  %v123_v7 = vmul.f32 -1.442695, %v43_v3  ;;  %s110_s6 = sshll.u32 %s229_s1, 4  ;;  %s111_s6 = int_to_ptr.vmem [resolvable:$true] %s110_s6 }
  0x29   :  { %129 = vpow2.f32 %v120_v4  ;;  %s197_s7 = scalar_lea.vmem %s111_s6, 16  ;;  %s201_s8 = scalar_lea.vmem %s111_s6, 32 }
  0x2a   :  { %131 = vpow2.f32 %v121_v5  ;;  %p198_p2 = scmp.ne.s32.totalorder %s111_s6, %s197_s7  ;;  %p202_p3 = scmp.lt.s32.totalorder %s111_s6, %s111_s6 }
  0x2b   :  { %133 = vpow2.f32 %v122_v6  ;;  %p203_p4 = scmp.lt.s32.totalorder %s201_s8, %s197_s7 }
  0x2c   :  { %135 = vpow2.f32 %v123_v7 }
  0x2d   :  { %p204_p5 = por %p203_p4, %p202_p3 }
  0x2f   :  { %p205_p6 = pnand %p204_p5, %p198_p2 }
  0x33   :  { %v130_v8 = vpop.eup %129 }
  0x34   :  { %v132_v9 = vpop.eup %131  ;;  %v50_v10 = vadd.f32 1.0, %v130_v8 }
  0x35   :  { %v134_v11 = vpop.eup %133  ;;  %v51_v12 = vadd.f32 1.0, %v132_v9 }
  0x36   :  { %v136_v13 = vpop.eup %135  ;;  %137 = vrcp.f32 %v50_v10  ;;  %v62_v14 = vadd.f32 1.0, %v134_v11 }
  0x37   :  { %139 = vrcp.f32 %v51_v12  ;;  %v63_v15 = vadd.f32 1.0, %v136_v13 }
  0x38   :  { %141 = vrcp.f32 %v62_v14 }
  0x39   :  { %143 = vrcp.f32 %v63_v15 }
  0x40   :  { %v138_v16 = vpop.eup %137 }
  0x41   :  { %v140_v17 = vpop.eup %139  ;;  %v76_v20 = vadd.f32 1e-08, %v138_v16  ;;  %v70_v27 = vsub.f32 1.0, %v138_v16 }
  0x42   :  { %v142_v18 = vpop.eup %141  ;;  %v77_v22 = vadd.f32 1e-08, %v140_v17  ;;  %v71_v29 = vsub.f32 1.0, %v140_v17 }
  0x43   :  { %v144_v19 = vpop.eup %143  ;;  %v78_v21 = vsub.f32 1.0, %v142_v18  ;;  %v68_v30 = vadd.f32 1e-08, %v142_v18  ;;  %v72_v31 = vadd.f32 1e-08, %v70_v27  ;;  %v84_v40 = vsub.f32 %v142_v18, %v138_v16 }
  0x44   :  { %v79_v23 = vsub.f32 1.0, %v144_v19  ;;  %v69_v32 = vadd.f32 1e-08, %v144_v19  ;;  %v73_v33 = vadd.f32 1e-08, %v71_v29  ;;  %v85_v42 = vsub.f32 %v144_v19, %v140_v17 }
  0x45   :  { %v80_v24 = vadd.f32 1e-08, %v78_v21  ;;  %v74_v34 = vmul.f32 %v72_v31, %v68_v30 }
  0x46   :  { %v81_v25 = vadd.f32 1e-08, %v79_v23  ;;  %v75_v35 = vmul.f32 %v73_v33, %v69_v32 }
  0x47   :  { %v82_v26 = vmul.f32 %v80_v24, %v76_v20 }
  0x48   :  { %v83_v28 = vmul.f32 %v81_v25, %v77_v22 }
  0x49   :  { %145 = vrcp.f32 %v82_v26 }
  0x4a   :  { %147 = vrcp.f32 %v83_v28 }
  0x53   :  { %v146_v36 = vpop.eup %145 }
  0x54   :  { %v148_v37 = vpop.eup %147  ;;  %v87_v38 = vmul.f32 %v146_v36, %v74_v34 }
  0x55   :  { %v89_v39 = vmul.f32 %v148_v37, %v75_v35 }
  0x56   :  { %149 = vlog2.f32 %v87_v38 }
  0x57   :  { %151 = vlog2.f32 %v89_v39 }
  0x60   :  { %v150_v41 = vpop.eup %149 }
  0x61   :  { %v152_v43 = vpop.eup %151  ;;  %v91_v44 = vmul.f32 0.6931472, %v150_v41 }
  0x62   :  { %v93_v45 = vmul.f32 0.6931472, %v152_v43 }
  0x63   :  { %v94_v46 = vmul.f32 %v91_v44, %v84_v40 }
  0x64   :  { %v95_v47 = vmul.f32 %v93_v45, %v85_v42 }
  0x66   :  { %v96_v48 = vadd.f32 %v95_v47, %v94_v46 }
  0x68   :  { %v97_v49 = vrot.slane %v96_v48, 4 }
  0x6a   :  { %v98_v50 = vadd.f32 %v97_v49, %v96_v48 }
  0x6c   :  { %v99_v51 = vrot.slane %v98_v50, 2 }
  0x6e   :  { %v100_v52 = vadd.f32 %v99_v51, %v98_v50 }
  0x70   :  { %v101_v53 = vrot.slane %v100_v52, 1 }
  0x72   :  { %v102_v54 = vadd.f32 %v101_v53, %v100_v52 }
  0x74   :  { %103 = vst [vmem:[#allocation7] sm:$0x1] %v102_v54 }
  0x75   :  { %208 = shalt.err (!%p205_p6)
}
  0x76   :  { %s209_s11 = scalar_lea.hbm %s283_s2, 16 }
  0x77   :  { %p210_p7 = scmp.ne.s32.totalorder %s283_s2, %s209_s11  ;;  %p213_p8 = scmp.lt.u32.totalorder %s209_s11, %s283_s2 }
  0x79   :  { %p215_p9 = pnand %p213_p8, %p210_p7 }
  0x7b   :  { %218 = shalt.err (!%p215_p9)
}
  0x7c   :  { %113 = dma.vmem_to_hbm [thread:$0]  %s111_s6, 16, %s283_s2, [#allocation4]  }
  0x7d   :  { %223 = dma.done.wait [#allocation4], 16  }
  0x7e   :  { %224 = vsyncadd [#allocation4], 4294967280 }
  0x7f   :  { %117 = vsyncpa [#allocation3], 1 }
  0x80   :  { %118 = vsyncpa [#allocation6], 1 }
  0x81   :  { %119 = vsyncpa [#allocation4], 1 }

</bundles_post_ra>
